<compile_context>
chip_gen: v7x
topology: tpu7x:2x2x1
jax: 0.10.0
libtpu: 0.0.40
codegen_flags: <defaults>
</compile_context>

<pallas_src>
import math

import jax
import jax.numpy as jnp
from jax.experimental import pallas as pl
from jax.experimental.pallas import tpu as pltpu


def _round_up(x, m):
    return ((x + m - 1) // m) * m


# Explicit scoped-VMEM limit: safe on v7x (64 MiB/TC) and below the 128 MiB of
# v5e/v6e, while lifting the conservative 32 MiB default.
_VMEM_LIMIT_BYTES = 48 * 1024 * 1024


# ----------------------------------------------------------------------------
# Pallas kernels
# ----------------------------------------------------------------------------
def _conv1d_im2col_kernel(x_ref, w_ref, b_ref, o_ref):
    # x_ref: (K_pad, TILE_L)     im2col slab (taps folded into K) for one
    #                            batch element / one L tile
    # w_ref: (Cout_pad, K_pad)   fused weights, VMEM-resident across the grid
    # b_ref: (Cout_pad, 1)       bias
    # o_ref: (Cout_pad, TILE_L)  lane-dense output tile
    acc = jnp.dot(w_ref[...], x_ref[...], preferred_element_type=jnp.float32)
    o_ref[...] = (acc + b_ref[...]).astype(o_ref.dtype)


def _avgpool1d_kernel(even_ref, odd_ref, o_ref):
    # even_ref / odd_ref / o_ref: (ROW_TILE, TILE_L) — pure VPU mean.
    a = even_ref[...].astype(jnp.float32)
    b = odd_ref[...].astype(jnp.float32)
    o_ref[...] = ((a + b) * 0.5).astype(o_ref.dtype)


# ----------------------------------------------------------------------------
# Wrappers (glue: im2col, padding/alignment, pallas_call plumbing)
# ----------------------------------------------------------------------------
def conv1d_stride2_pallas(x, weight, bias, padding, *, tile_l_cap=512):
    """x: (N, Cin, L), weight: (Cout, Cin, 3), bias: (Cout,)."""
    n, c_in, l = x.shape
    c_out = weight.shape[0]
    l_out = (l + 2 * padding - 3) // 2 + 1
    assert l_out >= 1

    # im2col in the wrapper: deinterleave the stride-2 taps with XLA so the
    # kernel only does contiguous, lane-dense loads (no in-kernel stride-2
    # lane gathers).  x_cols[n, k*Cin + c, l] = x_pad[n, c, 2*l + k].
    x_pad = jnp.pad(x, ((0, 0), (0, 0), (padding, padding)))
    taps = [x_pad[:, :, k:k + 2 * l_out:2] for k in range(3)]   # each (N,Cin,L_out)
    x_cols = jnp.concatenate(taps, axis=1)                      # (N, 3*Cin, L_out)

    # Fuse the 3 taps into one contraction: W2[o, k*Cin + c] = weight[o, c, k].
    w2 = jnp.transpose(weight, (0, 2, 1)).reshape(c_out, 3 * c_in).astype(x.dtype)

    # MXU / lane alignment: K multiple of 128, Cout multiple of 8,
    # L tile a multiple of 128 (lane-dense output stores).
    k_dim = 3 * c_in
    k_pad = _round_up(k_dim, 128)
    c_out_pad = _round_up(c_out, 8)
    tile_l = tile_l_cap if l_out >= tile_l_cap else _round_up(l_out, 128)
    l_out_pad = _round_up(l_out, tile_l)

    x_cols = jnp.pad(x_cols, ((0, 0), (0, k_pad - k_dim), (0, l_out_pad - l_out)))
    w2 = jnp.pad(w2, ((0, c_out_pad - c_out), (0, k_pad - k_dim)))
    b2 = jnp.pad(bias.astype(x.dtype), (0, c_out_pad - c_out)).reshape(c_out_pad, 1)

    grid = (n, l_out_pad // tile_l)
    y = pl.pallas_call(
        _conv1d_im2col_kernel,
        out_shape=jax.ShapeDtypeStruct((n, c_out_pad, l_out_pad), x.dtype),
        grid=grid,
        in_specs=[
            pl.BlockSpec((None, k_pad, tile_l), lambda i, j: (i, 0, j)),
            pl.BlockSpec((c_out_pad, k_pad), lambda i, j: (0, 0)),
            pl.BlockSpec((c_out_pad, 1), lambda i, j: (0, 0)),
        ],
        out_specs=pl.BlockSpec((None, c_out_pad, tile_l), lambda i, j: (i, 0, j)),
        compiler_params=pltpu.CompilerParams(
            dimension_semantics=("parallel", "parallel"),
            vmem_limit_bytes=_VMEM_LIMIT_BYTES),
    )(x_cols, w2, b2)
    # TODO(synk): halo handling could be moved in-kernel (pl.Element tiles) to
    # avoid materializing the im2col slab in HBM for very long sequences.
    return y[:, :c_out, :l_out]


def avgpool1d_stride2_pallas(x, *, tile_l_cap=1024, row_tile_cap=256):
    """x: (N, C, L) -> (N, C, L // 2)  (AvgPool1d(kernel_size=2, stride=2))."""
    n, c, l = x.shape
    l_out = l // 2
    if l_out == 0:
        return jnp.zeros((n, c, 0), x.dtype)

    rows = n * c
    x2 = x.reshape(rows, l)
    even = x2[:, 0:2 * l_out:2]          # deinterleave outside the kernel
    odd = x2[:, 1:2 * l_out:2]

    tile_l = tile_l_cap if l_out >= tile_l_cap else _round_up(l_out, 128)
    l_out_pad = _round_up(l_out, tile_l)
    row_tile = row_tile_cap if rows >= row_tile_cap else _round_up(rows, 8)
    rows_pad = _round_up(rows, row_tile)

    even = jnp.pad(even, ((0, rows_pad - rows), (0, l_out_pad - l_out)))
    odd = jnp.pad(odd, ((0, rows_pad - rows), (0, l_out_pad - l_out)))

    grid = (rows_pad // row_tile, l_out_pad // tile_l)
    y = pl.pallas_call(
        _avgpool1d_kernel,
        out_shape=jax.ShapeDtypeStruct((rows_pad, l_out_pad), x.dtype),
        grid=grid,
        in_specs=[
            pl.BlockSpec((row_tile, tile_l), lambda i, j: (i, j)),
            pl.BlockSpec((row_tile, tile_l), lambda i, j: (i, j)),
        ],
        out_specs=pl.BlockSpec((row_tile, tile_l), lambda i, j: (i, j)),
        compiler_params=pltpu.CompilerParams(
            dimension_semantics=("parallel", "parallel"),
            vmem_limit_bytes=_VMEM_LIMIT_BYTES),
    )(even, odd)
    return y[:rows, :l_out].reshape(n, c, l_out)


# ----------------------------------------------------------------------------
# Module port
# ----------------------------------------------------------------------------
class Downsample1D:
    """JAX/Pallas port of the PyTorch Downsample1D module (forward only)."""

    def __init__(self, channels, use_conv=False, out_channels=None, padding=1,
                 name="conv", *, key=None, dtype=jnp.float32):
        self.channels = channels
        self.out_channels = out_channels or channels
        self.use_conv = use_conv
        self.padding = padding
        self.name = name
        if use_conv:
            # Deterministic synthetic init (Conv1d-style uniform bound).
            if key is None:
                key = jax.random.PRNGKey(0)
            kw, kb = jax.random.split(key)
            fan_in = channels * 3
            bound = 1.0 / math.sqrt(fan_in)
            self.weight = jax.random.uniform(
                kw, (self.out_channels, channels, 3), dtype, -bound, bound)
            self.bias = jax.random.uniform(
                kb, (self.out_channels,), dtype, -bound, bound)
        else:
            assert self.channels == self.out_channels

    def __call__(self, hidden_states):
        assert hidden_states.shape[1] == self.channels
        if self.use_conv and self.padding == 0:
            # F.pad(hidden_states, (0, 1)) — pad one zero on the right of L.
            hidden_states = jnp.pad(hidden_states, ((0, 0), (0, 0), (0, 1)))
        assert hidden_states.shape[1] == self.channels
        if self.use_conv:
            return conv1d_stride2_pallas(
                hidden_states, self.weight, self.bias, self.padding)
        return avgpool1d_stride2_pallas(hidden_states)


# ----------------------------------------------------------------------------
# Pure-JAX references for validation
# ----------------------------------------------------------------------------
def _conv_ref(x, w, b, padding):
    y = jax.lax.conv_general_dilated(
        x, w, window_strides=(2,), padding=[(padding, padding)],
        dimension_numbers=("NCH", "OIH", "NCH"))
    return y + b[None, :, None]


def _avgpool_ref(x):
    n, c, l = x.shape
    return x[:, :, : 2 * (l // 2)].reshape(n, c, l // 2, 2).mean(-1)


if __name__ == "__main__":
    key = jax.random.PRNGKey(0)
    kx, kp, kx2, kp2 = jax.random.split(key, 4)

    N, C, L = 2, 4, 16
    x = jax.random.normal(kx, (N, C, L), jnp.float32)

    # --- use_conv=True, padding=1, out_channels != channels ------------------
    m_conv = Downsample1D(C, use_conv=True, out_channels=8, padding=1, key=kp)
    y = jax.block_until_ready(m_conv(x))
    y_ref = _conv_ref(x, m_conv.weight, m_conv.bias, padding=1)
    assert y.shape == (N, 8, 8), y.shape
    assert jnp.allclose(y, y_ref, atol=1e-4, rtol=1e-5)

    # --- use_conv=True, padding=0 (exercises the F.pad(0,1) branch) ----------
    m_conv0 = Downsample1D(C, use_conv=True, out_channels=8, padding=0, key=kp)
    y0 = jax.block_until_ready(m_conv0(x))
    x_rp = jnp.pad(x, ((0, 0), (0, 0), (0, 1)))
    y0_ref = _conv_ref(x_rp, m_conv0.weight, m_conv0.bias, padding=0)
    assert y0.shape == y0_ref.shape
    assert jnp.allclose(y0, y0_ref, atol=1e-4, rtol=1e-5)

    # --- use_conv=True, longer sequence (exercises multi-L-tile grid) --------
    x_big = jax.random.normal(kx2, (1, 3, 1040), jnp.float32)
    m_big = Downsample1D(3, use_conv=True, out_channels=5, padding=1, key=kp2)
    yb = jax.block_until_ready(m_big(x_big))
    yb_ref = _conv_ref(x_big, m_big.weight, m_big.bias, padding=1)
    assert yb.shape == yb_ref.shape, (yb.shape, yb_ref.shape)
    assert jnp.allclose(yb, yb_ref, atol=1e-4, rtol=1e-5)

    # --- use_conv=False (AvgPool1d(2, 2)) -------------------------------------
    m_pool = Downsample1D(C, use_conv=False)
    yp = jax.block_until_ready(m_pool(x))
    assert yp.shape == (N, C, L // 2)
    assert jnp.allclose(yp, _avgpool_ref(x), atol=1e-6, rtol=1e-6)

    # --- use_conv=False, odd length (truncation semantics) --------------------
    x_odd = jax.random.normal(kx2, (N, C, 17), jnp.float32)
    yo = jax.block_until_ready(m_pool(x_odd))
    assert yo.shape == (N, C, 8)
    assert jnp.allclose(yo, _avgpool_ref(x_odd), atol=1e-6, rtol=1e-6)

    print("KERNEL_OK")
</pallas_src>

<mosaic_0001>
module attributes {stable_mosaic.version = 11 : i64} {
  func.func @_conv1d_im2col_kernel(%arg0: i32, %arg1: i32, %arg2: memref<1x128x128xf32, #tpu.memory_space<vmem>>, %arg3: memref<8x128xf32, #tpu.memory_space<vmem>>, %arg4: memref<8x1xf32, #tpu.memory_space<vmem>>, %arg5: memref<1x8x128xf32, #tpu.memory_space<vmem>>) attributes {dimension_semantics = [#tpu.dimension_semantics<parallel>, #tpu.dimension_semantics<parallel>], iteration_bounds = array<i64: 2, 1>, scalar_prefetch = 0 : i64, scratch_operands = 0 : i64, tpu.core_type = #tpu.core_type<tc>, window_params = [{transform_indices = @transform_0, window_bounds = array<i64: 1, 128, 128>}, {pipeline_mode = #tpu.pipeline_mode<synchronous>, transform_indices = @transform_1, window_bounds = array<i64: 8, 128>}, {pipeline_mode = #tpu.pipeline_mode<synchronous>, transform_indices = @transform_2, window_bounds = array<i64: 8, 1>}, {transform_indices = @transform_3, window_bounds = array<i64: 1, 8, 128>}]} {
    %c0 = arith.constant 0 : index
    %c0_0 = arith.constant 0 : index
    %0 = vector.load %arg3[%c0, %c0_0] : memref<8x128xf32, #tpu.memory_space<vmem>>, vector<8x128xf32>
    %c0_1 = arith.constant 0 : index
    %c0_2 = arith.constant 0 : index
    %c0_3 = arith.constant 0 : index
    %1 = vector.load %arg2[%c0_1, %c0_2, %c0_3] : memref<1x128x128xf32, #tpu.memory_space<vmem>>, vector<1x128x128xf32>
    %2 = vector.shape_cast %1 : vector<1x128x128xf32> to vector<128x128xf32>
    %cst = arith.constant dense<0.000000e+00> : vector<8x128xf32>
    %3 = tpu.matmul %0, %2, %cst {dimension_numbers = #tpu.dot_dimension_numbers<[1], [0], [0], [1], [0, 0, 1, 1], [], []>} : vector<8x128xf32>, vector<128x128xf32>, vector<8x128xf32> -> vector<8x128xf32>
    %c0_4 = arith.constant 0 : index
    %c0_5 = arith.constant 0 : index
    %4 = vector.load %arg4[%c0_4, %c0_5] : memref<8x1xf32, #tpu.memory_space<vmem>>, vector<8x1xf32>
    %5 = vector.broadcast %4 : vector<8x1xf32> to vector<8x128xf32>
    %6 = arith.addf %3, %5 : vector<8x128xf32>
    %c0_6 = arith.constant 0 : index
    %c0_7 = arith.constant 0 : index
    %c0_8 = arith.constant 0 : index
    %7 = vector.load %arg5[%c0_6, %c0_7, %c0_8] : memref<1x8x128xf32, #tpu.memory_space<vmem>>, vector<1x8x128xf32>
    %8 = vector.shape_cast %7 : vector<1x8x128xf32> to vector<8x128xf32>
    %9 = vector.shape_cast %6 : vector<8x128xf32> to vector<1x8x128xf32>
    tpu.vector_store %arg5[%c0_6, %c0_7, %c0_8], %9 {strides = array<i32>} : memref<1x8x128xf32, #tpu.memory_space<vmem>>, vector<1x8x128xf32>,
    return
  }
  func.func @transform_0(%arg0: i32, %arg1: i32) -> (i32, i32, i32) {
    %c0_i32 = arith.constant 0 : i32
    %c0_i32_0 = arith.constant 0 : i32
    return %arg0, %c0_i32, %arg1 : i32, i32, i32
  }
  func.func @transform_1(%arg0: i32, %arg1: i32) -> (i32, i32) {
    %c0_i32 = arith.constant 0 : i32
    %c0_i32_0 = arith.constant 0 : i32
    %c0_i32_1 = arith.constant 0 : i32
    return %c0_i32, %c0_i32_0 : i32, i32
  }
  func.func @transform_2(%arg0: i32, %arg1: i32) -> (i32, i32) {
    %c0_i32 = arith.constant 0 : i32
    %c0_i32_0 = arith.constant 0 : i32
    %c0_i32_1 = arith.constant 0 : i32
    return %c0_i32, %c0_i32_0 : i32, i32
  }
  func.func @transform_3(%arg0: i32, %arg1: i32) -> (i32, i32, i32) {
    %c0_i32 = arith.constant 0 : i32
    %c0_i32_0 = arith.constant 0 : i32
    return %arg0, %c0_i32, %arg1 : i32, i32, i32
  }
}

</mosaic_0001>

<bundles_post_ra>
// kernel: tpu_custom_call.1
= control target key start
LH: loop header
LB: loop body
LE: loop exit
PB: predicated region body
PF: predicated region fallthrough
CT: control target
= control target key end

     0   :  { %8 = vsyncpa [#allocation3], 0  ;;  %s896_s0 = inlined_call_operand.hbm [shape: f32[2,128,128], index: 0, kind: input, shape index: {}]   ;;  %s897_s1 = inlined_call_operand.vmem [shape: f32[8,128], index: 1, kind: input, shape index: {}]   ;;  %s898_s2 = inlined_call_operand.vmem [shape: f32[8,1], index: 2, kind: input, shape index: {}]   ;;  %s899_s3 = inlined_call_operand.hbm [shape: f32[2,8,128], index: 3, kind: output, shape index: {}]  }
   0x1   :  { %10 = vsyncpa [#allocation3 + $0x1], 0 }
   0x2   :  { %11 = vsyncpa [#allocation4], 0 }
   0x3   :  { %13 = vsyncpa [#allocation4 + $0x1], 0  ;;  %s698_s12 = smov 0   ;;  %s700_s13 = smov 0  }
   0x4   :  { %s702_s14 = smov 0   ;;  %s704_s15 = smov 0  }
   0x5   :  { %s706_s16 = smov 0   ;;  %s708_s17 = smov 0  }
   0x6 LB: > { %s396_s18 = sadd.s32 4294967295, %s668_s17   ;;  %s397_s19 = sadd.s32 4294967294, %s668_s17   ;;  %s668_s17 = sphi %s708_s17, %s19_s17   ;;  %s664_s16 = sphi %s706_s16, %s914_s16   ;;  %s660_s15 = sphi %s704_s15, %s913_s15   ;;  %s656_s14 = sphi %s702_s14, %s912_s14   ;;  %s652_s13 = sphi %s700_s13, %s911_s13   ;;  %s648_s12 = sphi %s698_s12, %s910_s12  }
   0x7   : > { %s31_s20 = sadd.s32 1, %s664_s16  ;;  %s40_s21 = sadd.s32 1, %s656_s14 }
   0x8   : > { %p33_p0 = scmp.ge.s32.totalorder %s31_s20, 2  ;;  %p47_p1 = scmp.ne.s32.totalorder %s656_s14, %s652_s13 }
   0x9   : > { %p48_p2 = scmp.eq.s32.totalorder %s668_s17, 0  ;;  %p53_p3 = scmp.ne.s32.totalorder %s652_s13, %s648_s12 }
   0xa   : > { %s916_s20 = smov (%p33_p0, %s31_s20), 0  ;;  %p54_p5 = scmp.eq.s32.totalorder %s396_s18, 0 }
   0xb   : > { %p739_p4 = por %p48_p2, %p47_p1  ;;  %s35_s23 = ssub.s32 %s664_s16, %s916_s20 }
   0xc   : > { %p121_p6 = scmp.eq.s32.totalorder %s396_s18, 1  ;;  %p38_p7 = scmp.eq.s32.totalorder %s35_s23, 0 }
   0xd   : > { %p745_p8 = por %p54_p5, %p53_p3  ;;  %p127_p10 = scmp.eq.s32.totalorder %s397_s19, 1 }
   0xe   : > { %p749_p9 = por %p121_p6, %p47_p1  ;;  %p499_p13 = scmp.lt.s32.totalorder %s668_s17, 2 }
   0xf   : > { %s754_s26 = scalar_select %p38_p7, %s656_s14, %s40_s21  }
  0x10   : > { %s903_s25 = scalar_select %p749_p9, 1, 0 }
  0x11   : > { %p756_p11 = por %p127_p10, %p53_p3  ;;  %s153_s28 = sand.u32 1, %s656_s14  }
  0x12   : > { %s400_s29 = sshll.u32 %s153_s28, 7  ;;  %s410_s30 = sshll.u32 %s664_s16, 11 }
  0x13   : > { %s904_s27 = scalar_select %p756_p11, 1, 0 }
  0x14   : > { %s767_s6 = scalar_lea.hbm %s896_s0, %s410_s30  ;;  %s157_s7 = scalar_lea.vmem [#allocation2], %s400_s29 }
  0x15   : > { %s165_s8 = sshll.u32 %s157_s7, 4  ;;  %p773_p0 = pnand %p499_p13, %p739_p4  ;;  %s769_s8 = int_to_ptr.vmem [resolvable:$true] %s165_s8 }
  0x16   : > { %s778_s10 = scalar_lea.sflag [#allocation3], %s153_s28  ;;  %s556_s11 = scalar_lea.hbm %s767_s6, 2048 }
  0x17   : > { %p557_p2 = scmp.ne.s32.totalorder %s767_s6, %s556_s11  ;;  %p558_p3 = pneg %p773_p0 }
  0x18   : > { %s561_s21 = scalar_lea.hbm %s896_s0, 4096  ;;  %p562_p4 = scmp.lt.u32.totalorder %s767_s6, %s896_s0 }
  0x19   : > { %p559_p5 = pnand %p558_p3, %p557_p2  ;;  %p563_p7 = scmp.lt.u32.totalorder %s561_s21, %s556_s11 }
  0x1a   : > { %p565_p13 = scmp.lt.u32.totalorder %s556_s11, %s767_s6 }
  0x1b   : > { %p560_p6 = pneg %p559_p5  ;;  %p564_p10 = por %p563_p7, %p562_p4 }
  0x1d   : > { %p566_p12 = por %p565_p13, %p564_p10 }
  0x1f   : > { %p567_p1 = pnand %p566_p12, %p560_p6 }
  0x21   : > { %570 = shalt.err (!%p567_p1)
}
  0x22   : > { %s571_s28 = scalar_lea.vmem %s769_s8, 2048  ;;  %s670_s29 = smov [#allocation2]  }
  0x23   : > { %p572_p2 = scmp.ne.s32.totalorder %s769_s8, %s571_s28  ;;  %s576_s30 = sshll.u32 %s670_s29, 4  ;;  %s577_s30 = int_to_ptr.vmem [resolvable:$false] %s576_s30 }
  0x24   : > { %s578_s4 = scalar_lea.vmem %s577_s30, 4096  ;;  %p579_p9 = scmp.lt.s32.totalorder %s769_s8, %s577_s30 }
  0x25   : > { %p574_p5 = pnand %p572_p2, %p558_p3  ;;  %p580_p4 = scmp.lt.s32.totalorder %s578_s4, %s571_s28 }
  0x27   : > { %p575_p11 = pneg %p574_p5  ;;  %p581_p7 = por %p580_p4, %p579_p9 }
  0x29   : > { %p582_p10 = pnand %p581_p7, %p575_p11 }
  0x2b   : > { %585 = shalt.err (!%p582_p10)
}
  0x2c   : > { %s671_s5 = smov 128   ;;  %s672_s7 = smov 8  }
  0x2d   : > { %494 = dma.hbm_to_vmem [thread:$0]  (!%p773_p0), %s767_s6, 2048, %s769_s8, %s778_s10, %s671_s5, %s671_s5, %s672_s7  }
  0x2e   : > { %p173_p12 = scmp.lt.s32.totalorder %s668_s17, 3  ;;  %p906_p1 = scmp.ge.s32.totalorder %s668_s17, 1 }
  0x30   : > { %p174_p3 = pnand %p906_p1, %p173_p12 }
  0x31   : > { %s810_s11 = sand.u32 (!%p174_p3), 1, %s652_s13  }
  0x32   : > { %177 = sbr.rel (%p174_p3) target bundleno = 321 (0x141), region = 32  ;;  %s404_s18 = sshll.u32 (!%p174_p3), %s810_s11, 7 }
  0x33   : > { %s180_s19 = scalar_lea.sflag (!%p174_p3), [#allocation3], %s810_s11  ;;  %s814_s21 = scalar_lea.vmem (!%p174_p3), [#allocation2], %s404_s18 }
  0x39   : > { %639 = dma.done.wait (%p745_p8), %s180_s19, 2048  }
  0x3a   : > { %641 = vsyncadd (%p745_p8), %s180_s19, 4294965248  ;;  %v673_v0 = vmov 0.0|0.0   ;;  %vm674_vm0 = vmmov 0   ;;  %v675_v1 = vmov 0.0   ;;  %v676_v2 = vmov 0   ;;  %v207_v3 = vld [vmem:[%s814_s21] sm:$0xff] }
  0x3b   : > { %463 = vmatprep.subr.bf16.mxu0 %v673_v0  ;;  %460 = vmatprep.mubr.msk.f32.mxu0 %vm674_vm0, %v675_v1  ;;  %v208_v4 = vld [vmem:[%s814_s21 + $0x8] sm:$0xff]  ;;  %v209_v5 = vld [vmem:[%s814_s21 + $0x10] sm:$0xff]  ;;  %v210_v7 = vld [vmem:[%s814_s21 + $0x18] sm:$0xff]  ;;  %s405_s10 = sshll.u32 %s810_s11, 3  ;;  %s407_s22 = sshll.u32 %s660_s15, 7 }
  0x3c   : > { %555 = vset.pattern.permute.xlu0 %v676_v2  ;;  %v464_v6 = vpack.c.bf16 %v208_v4, %v207_v3  ;;  %v467_v8 = vpack.c.bf16 %v210_v7, %v209_v5  ;;  %v211_v9 = vld [vmem:[%s814_s21 + $0x20] sm:$0xff]  ;;  %v212_v10 = vld [vmem:[%s814_s21 + $0x28] sm:$0xff]  ;;  %v213_v13 = vld [vmem:[%s814_s21 + $0x30] sm:$0xff]  ;;  %s205_s23 = scalar_lea.vmem [#allocation5], %s405_s10  ;;  %s847_s4 = scalar_lea.hbm %s899_s3, %s407_s22 }
  0x3d   : > { %v223_v11 = vld [vmem:[%s898_s2] sm:$0xff]  ;;  %v470_v12 = vpack.c.bf16 %v212_v10, %v211_v9  ;;  %v214_v14 = vld [vmem:[%s814_s21 + $0x38] sm:$0xff]  ;;  %v216_v17 = vld [vmem:[%s814_s21 + $0x48] sm:$0xff]  ;;  %s315_s28 = sshll.u32 %s205_s23, 4  ;;  %s301_s5 = scalar_lea.sflag [#allocation4], %s810_s11  ;;  %s849_s28 = int_to_ptr.vmem [resolvable:$true] %s315_s28 }
  0x3e   : > { %465 = vmatpush3.bf16.msra.mxu0 %v464_v6  ;;  %226 = vperm.xlu0 %555, %v223_v11   ;;  %v473_v15 = vpack.c.bf16 %v214_v14, %v213_v13  ;;  %v215_v16 = vld [vmem:[%s814_s21 + $0x40] sm:$0xff]  ;;  %v217_v19 = vld [vmem:[%s814_s21 + $0x50] sm:$0xff]  ;;  %v218_v20 = vld [vmem:[%s814_s21 + $0x58] sm:$0xff]  ;;  %s586_s7 = scalar_lea.vmem %s849_s28, 128  ;;  %p907_p9 = scmp.ne.s32.totalorder %s903_s25, 0 }
  0x3f   : > { %466 = vmatprep.subr.bf16.mxu0 %v673_v0  ;;  %v476_v18 = vpack.c.bf16 %v216_v17, %v215_v16  ;;  %v479_v21 = vpack.c.bf16 %v218_v20, %v217_v19  ;;  %v219_v22 = vld [vmem:[%s814_s21 + $0x60] sm:$0xff]  ;;  %v220_v23 = vld [vmem:[%s814_s21 + $0x68] sm:$0xff]  ;;  %v221_v25 = vld [vmem:[%s814_s21 + $0x70] sm:$0xff]  ;;  %p587_p8 = scmp.ne.s32.totalorder %s849_s28, %s586_s7  ;;  %s677_s15 = smov [#allocation5]  }
  0x40   : > { %v482_v24 = vpack.c.bf16 %v220_v23, %v219_v22  ;;  %v222_v26 = vld [vmem:[%s814_s21 + $0x78] sm:$0xff]  ;;  %v206_v28 = vld [vmem:[%s897_s1] sm:$0xff]  ;;  %s590_s18 = sshll.u32 %s677_s15, 4  ;;  %s591_s18 = int_to_ptr.vmem [resolvable:$false] %s590_s18 }
  0x41   : > { %v485_v27 = vpack.c.bf16 %v222_v26, %v221_v25  ;;  %p588_p11 = pnand %p587_p8, %p907_p9  ;;  %s592_s19 = scalar_lea.vmem %s591_s18, 256 }
  0x42   : > { %468 = vmatpush3.bf16.msra.mxu0 %v467_v8  ;;  %p593_p6 = scmp.lt.s32.totalorder %s849_s28, %s591_s18  ;;  %p594_p13 = scmp.lt.s32.totalorder %s592_s19, %s586_s7 }
  0x43   : > { %469 = vmatprep.subr.bf16.mxu0 %v673_v0  ;;  %p589_p0 = pneg %p588_p11 }
  0x44   : > { %p595_p2 = por %p594_p13, %p593_p6 }
  0x46   : > { %471 = vmatpush3.bf16.msra.mxu0 %v470_v12  ;;  %p596_p5 = pnand %p595_p2, %p589_p0 }
  0x47   : > { %472 = vmatprep.subr.bf16.mxu0 %v673_v0 }
  0x4a   : > { %474 = vmatpush3.bf16.msra.mxu0 %v473_v15 }
  0x4b   : > { %475 = vmatprep.subr.bf16.mxu0 %v673_v0 }
  0x4e   : > { %477 = vmatpush3.bf16.msra.mxu0 %v476_v18 }
  0x4f   : > { %478 = vmatprep.subr.bf16.mxu0 %v673_v0 }
  0x52   : > { %480 = vmatpush3.bf16.msra.mxu0 %v479_v21 }
  0x53   : > { %481 = vmatprep.subr.bf16.mxu0 %v673_v0 }
  0x56   : > { %483 = vmatpush3.bf16.msra.mxu0 %v482_v24 }
  0x57   : > { %484 = vmatprep.subr.bf16.mxu0 %v673_v0 }
  0x5a   : > { %486 = vmatpush3.bf16.msra.mxu0 %v485_v27 }
  0x5d   : > { %461 = vmatmul.mubr.f32.vlgmr.msra.gmra.mrb[0].mxu0 %v206_v28 }
  0xbd   : > { %v227_v29 = vpop.permute.xlu0 %226 }
 0x130   : > { %v295_v30 = vpop.f32.mrb[0].mxu0 }
 0x131   : > { %v296_v31 = vadd.f32 %v295_v30, %v227_v29  ;;  %v462_v32 = vpop.f32.mrb[1].mxu0 }
 0x133   : > { %299 = vst [vmem:[%s205_s23] sm:$0xff] %v296_v31 }
 0x134   : > { %599 = shalt.err (!%p596_p5)
}
 0x135   : > { %s600_s11 = scalar_lea.hbm %s847_s4, 128  ;;  %s604_s6 = scalar_lea.hbm %s899_s3, 256 }
 0x136   : > { %p601_p4 = scmp.ne.s32.totalorder %s847_s4, %s600_s11  ;;  %p605_p12 = scmp.lt.u32.totalorder %s847_s4, %s899_s3 }
 0x137   : > { %p606_p1 = scmp.lt.u32.totalorder %s604_s6, %s600_s11  ;;  %p608_p8 = scmp.lt.u32.totalorder %s600_s11, %s847_s4 }
 0x138   : > { %p602_p7 = pnand %p601_p4, %p907_p9 }
 0x139   : > { %p607_p3 = por %p606_p1, %p605_p12 }
 0x13a   : > { %p603_p10 = pneg %p602_p7 }
 0x13b   : > { %p609_p11 = por %p608_p8, %p607_p3 }
 0x13d   : > { %p610_p0 = pnand %p609_p11, %p603_p10 }
 0x13f   : > { %613 = shalt.err (!%p610_p0)
}
 0x140   : > { %489 = dma.vmem_to_hbm [thread:$0]  (%p907_p9), %s849_s28, 128, %s847_s4, %s301_s5  }
 0x141 PF: > { %s327_s10 = sand.u32 1, %s648_s12   ;;  %p908_p6 = scmp.ne.s32.totalorder %s904_s27, 0 }
 0x142   : > { %p909_p13 = scmp.ge.s32.totalorder %s668_s17, 2  ;;  %s328_s22 = scalar_lea.sflag [#allocation4], %s327_s10 }
 0x144   : > { %p496_p2 = pnand %p909_p13, %p908_p6 }
 0x146   : > { %643 = dma.done.wait (!%p496_p2), %s328_s22, 128  }
 0x147   : > { %645 = vsyncadd (!%p496_p2), %s328_s22, 4294967168  ;;  %s19_s17 = sadd.s32 1, %s668_s17   ;;  %s910_s12 = smov %s652_s13 }
 0x148   : > { %p16_p5 = scmp.ge.s32.totalorder %s19_s17, 4   ;;  %s911_s13 = smov %s656_s14 }
 0x149   : > { %s912_s14 = smov %s754_s26  ;;  %s913_s15 = smov %s664_s16 }
 0x14a   : > { %s914_s16 = smov %s916_s20  ;;  %18 = sbr.rel (!%p16_p5) target bundleno = 6 (0x6), region = 77 }
 0x151   :  { %333 = vsyncpa [#allocation3], 1 }
 0x152   :  { %335 = vsyncpa [#allocation3 + $0x1], 1 }
 0x153   :  { %336 = vsyncpa [#allocation4], 1 }
 0x154   :  { %338 = vsyncpa [#allocation4 + $0x1], 1 }

</bundles_post_ra>
